<compile_context>
chip_gen: v6e
topology: v6e:2x2x1
jax: 0.10.0
libtpu: 0.0.40
codegen_flags: <defaults>
</compile_context>

<pallas_src>
import jax
import jax.numpy as jnp
from jax.experimental import pallas as pl
from jax.experimental.pallas import tpu as pltpu


def _round_up(n, m):
    return ((n + m - 1) // m) * m


def mlp_softmax_kernel(x_ref, w1_ref, b1_ref, w2_ref, b2_ref, out_ref):
    # Two MXU matmuls + VPU ReLU + numerically stable softmax, all in VMEM.
    x = x_ref[...]                                            # (bb, in_size)

    # Linear 1 + ReLU (hidden padded to 128 lanes; padded cols are exactly 0)
    h = jnp.dot(x, w1_ref[...], preferred_element_type=jnp.float32) + b1_ref[...]
    h = jnp.maximum(h, 0.0)

    # Linear 2 (padded hidden rows of W2 are zero -> contribute nothing)
    logits = jnp.dot(h, w2_ref[...], preferred_element_type=jnp.float32) + b2_ref[...]

    # Softmax over the real class axis (no padded classes anymore).
    m = jnp.max(logits, axis=-1, keepdims=True)
    e = jnp.exp(logits - m)
    denom = jnp.sum(e, axis=-1, keepdims=True)
    out_ref[...] = (e * pl.reciprocal(denom, approx=False)).astype(out_ref.dtype)


def pad_params(w1, b1, w2, b2):
    """Pad ONLY the internal hidden dim to 128 lanes (do this once at load time).

    Input/output feature dims keep their real sizes so x and the probabilities
    move through HBM unpadded.
    """
    in_size, hidden = w1.shape
    out_size = w2.shape[1]
    hid_p = _round_up(hidden, 128)
    f32 = jnp.float32
    w1_p = jnp.zeros((in_size, hid_p), f32).at[:, :hidden].set(w1.astype(f32))
    b1_p = jnp.zeros((1, hid_p), f32).at[:, :hidden].set(b1.astype(f32).reshape(1, hidden))
    w2_p = jnp.zeros((hid_p, out_size), f32).at[:hidden, :].set(w2.astype(f32))
    b2_p = b2.astype(f32).reshape(1, out_size)
    return w1_p, b1_p, w2_p, b2_p


def fully_connected_output(x, w1_p, b1_p, w2_p, b2_p, *, block_b=8192):
    """x: [B, input_size]; params from pad_params(); returns [B, output_size] probs."""
    B, in_size = x.shape
    hid_p = w1_p.shape[1]
    out_size = w2_p.shape[1]
    assert w1_p.shape[0] == in_size and w2_p.shape[0] == hid_p

    # --- batch tiling: one big tile unless the batch is large -----------------
    n_tiles = max(1, -(-B // block_b))          # ceil(B / block_b)
    if B >= 2048:
        n_tiles = max(n_tiles, 2)               # let v7x's two TensorCores split it
    bb = _round_up(-(-B // n_tiles), 8)         # rows per tile, multiple of 8
    B_p = bb * n_tiles

    x_f = x.astype(jnp.float32)                 # no-op for f32 callers
    if B_p != B:
        # Pad only rows of the narrow (B, in_size) array; no column padding.
        x_f = jnp.pad(x_f, ((0, B_p - B), (0, 0)))

    # Advisory cost estimate with real (unpadded) batch bytes/flops.
    flops = 2 * B * (in_size * hid_p + hid_p * out_size)
    bytes_accessed = 4 * (B * (in_size + out_size)
                          + in_size * hid_p + hid_p * out_size + hid_p + out_size)
    cost = pl.CostEstimate(flops=flops, transcendentals=B * out_size,
                           bytes_accessed=bytes_accessed)

    probs = pl.pallas_call(
        mlp_softmax_kernel,
        out_shape=jax.ShapeDtypeStruct((B_p, out_size), x.dtype),
        grid_spec=pltpu.PrefetchScalarGridSpec(
            num_scalar_prefetch=0,
            grid=(n_tiles,),
            in_specs=[
                pl.BlockSpec((bb, in_size), lambda i: (i, 0)),     # x tile, real cols
                pl.BlockSpec((in_size, hid_p), lambda i: (0, 0)),  # W1 (resident)
                pl.BlockSpec((1, hid_p), lambda i: (0, 0)),        # b1
                pl.BlockSpec((hid_p, out_size), lambda i: (0, 0)), # W2 (resident)
                pl.BlockSpec((1, out_size), lambda i: (0, 0)),     # b2
            ],
            out_specs=pl.BlockSpec((bb, out_size), lambda i: (i, 0)),  # real out cols
        ),
        compiler_params=pltpu.CompilerParams(
            dimension_semantics=("parallel",),
            vmem_limit_bytes=32 * 1024 * 1024,  # safe on v5e/v6e/v7x; buffers are tiny
        ),
        cost_estimate=cost,
    )(x_f, w1_p, b1_p, w2_p, b2_p)

    if B_p != B:
        probs = probs[:B]
    return probs


def init_params(key, input_size, layer_units, output_size):
    """Deterministic init mimicking nn.Linear (uniform(-1/sqrt(fan_in), +...))."""
    units = [input_size] + list(layer_units) + [output_size]
    params = []
    for in_size, out_size in zip(units, units[1:]):
        key, kw, kb = jax.random.split(key, 3)
        bound = 1.0 / jnp.sqrt(in_size)
        # stored as [in, out] so the kernel computes x @ W directly
        w = jax.random.uniform(kw, (in_size, out_size), jnp.float32, -bound, bound)
        b = jax.random.uniform(kb, (1, out_size), jnp.float32, -bound, bound)
        params.append((w, b))
    return params


def reference_forward(x, params):
    h = x
    for i, (w, b) in enumerate(params):
        h = h @ w + b
        if i < len(params) - 1:
            h = jnp.maximum(h, 0.0)
    return jax.nn.softmax(h, axis=1)


if __name__ == "__main__":
    input_size = 32
    layer_units = (10,)        # module default
    output_size = 16
    batch = 64                 # small demo batch -> single grid step

    key = jax.random.PRNGKey(0)
    key, kx = jax.random.split(key)
    x = jax.random.normal(kx, (batch, input_size), jnp.float32)

    params = init_params(key, input_size, layer_units, output_size)
    (w1, b1), (w2, b2) = params
    w1_p, b1_p, w2_p, b2_p = pad_params(w1, b1, w2, b2)   # hoisted, once at "load"

    probs = fully_connected_output(x, w1_p, b1_p, w2_p, b2_p)
    probs = jax.block_until_ready(probs)

    ref = reference_forward(x, params)
    assert probs.shape == (batch, output_size)
    assert jnp.allclose(probs, ref, atol=1e-5, rtol=1e-5), "mismatch vs reference"
    assert jnp.allclose(jnp.sum(probs, axis=1), 1.0, atol=1e-5)

    print("KERNEL_OK")
</pallas_src>

<mosaic_0001>
module attributes {stable_mosaic.version = 11 : i64} {
  func.func @mlp_softmax_kernel(%arg0: i32, %arg1: memref<64x32xf32, #tpu.memory_space<vmem>>, %arg2: memref<32x128xf32, #tpu.memory_space<vmem>>, %arg3: memref<1x128xf32, #tpu.memory_space<vmem>>, %arg4: memref<128x16xf32, #tpu.memory_space<vmem>>, %arg5: memref<1x16xf32, #tpu.memory_space<vmem>>, %arg6: memref<64x16xf32, #tpu.memory_space<vmem>>) attributes {dimension_semantics = [#tpu.dimension_semantics<parallel>], iteration_bounds = array<i64: 1>, scalar_prefetch = 0 : i64, scratch_operands = 0 : i64, tpu.core_type = #tpu.core_type<tc>, window_params = [{transform_indices = @transform_0, window_bounds = array<i64: 64, 32>}, {pipeline_mode = #tpu.pipeline_mode<synchronous>, transform_indices = @transform_1, window_bounds = array<i64: 32, 128>}, {pipeline_mode = #tpu.pipeline_mode<synchronous>, transform_indices = @transform_2, window_bounds = array<i64: 1, 128>}, {pipeline_mode = #tpu.pipeline_mode<synchronous>, transform_indices = @transform_3, window_bounds = array<i64: 128, 16>}, {pipeline_mode = #tpu.pipeline_mode<synchronous>, transform_indices = @transform_4, window_bounds = array<i64: 1, 16>}, {transform_indices = @transform_5, window_bounds = array<i64: 64, 16>}]} {
    %c0 = arith.constant 0 : index
    %c0_0 = arith.constant 0 : index
    %0 = vector.load %arg1[%c0, %c0_0] : memref<64x32xf32, #tpu.memory_space<vmem>>, vector<64x32xf32>
    %c0_1 = arith.constant 0 : index
    %c0_2 = arith.constant 0 : index
    %1 = vector.load %arg2[%c0_1, %c0_2] : memref<32x128xf32, #tpu.memory_space<vmem>>, vector<32x128xf32>
    %cst = arith.constant dense<0.000000e+00> : vector<64x128xf32>
    %2 = tpu.matmul %0, %1, %cst {dimension_numbers = #tpu.dot_dimension_numbers<[1], [0], [0], [1], [0, 0, 1, 1], [], []>} : vector<64x32xf32>, vector<32x128xf32>, vector<64x128xf32> -> vector<64x128xf32>
    %c0_3 = arith.constant 0 : index
    %c0_4 = arith.constant 0 : index
    %3 = vector.load %arg3[%c0_3, %c0_4] : memref<1x128xf32, #tpu.memory_space<vmem>>, vector<1x128xf32>
    %4 = vector.broadcast %3 : vector<1x128xf32> to vector<64x128xf32>
    %5 = arith.addf %2, %4 : vector<64x128xf32>
    %cst_5 = arith.constant 0.000000e+00 : f32
    %6 = vector.broadcast %cst_5 : f32 to vector<64x128xf32>
    %7 = arith.maximumf %5, %6 : vector<64x128xf32>
    %c0_6 = arith.constant 0 : index
    %c0_7 = arith.constant 0 : index
    %8 = vector.load %arg4[%c0_6, %c0_7] : memref<128x16xf32, #tpu.memory_space<vmem>>, vector<128x16xf32>
    %cst_8 = arith.constant dense<0.000000e+00> : vector<64x16xf32>
    %9 = tpu.matmul %7, %8, %cst_8 {dimension_numbers = #tpu.dot_dimension_numbers<[1], [0], [0], [1], [0, 0, 1, 1], [], []>} : vector<64x128xf32>, vector<128x16xf32>, vector<64x16xf32> -> vector<64x16xf32>
    %c0_9 = arith.constant 0 : index
    %c0_10 = arith.constant 0 : index
    %10 = vector.load %arg5[%c0_9, %c0_10] : memref<1x16xf32, #tpu.memory_space<vmem>>, vector<1x16xf32>
    %11 = vector.broadcast %10 : vector<1x16xf32> to vector<64x16xf32>
    %12 = arith.addf %9, %11 : vector<64x16xf32>
    %cst_11 = arith.constant dense<0xFF800000> : vector<64xf32>
    %13 = vector.multi_reduction <maximumf>, %12, %cst_11 [1] : vector<64x16xf32> to vector<64xf32>
    %14 = vector.shape_cast %13 : vector<64xf32> to vector<64x1xf32>
    %15 = vector.broadcast %14 : vector<64x1xf32> to vector<64x16xf32>
    %16 = arith.subf %12, %15 : vector<64x16xf32>
    %17 = math.exp %16 : vector<64x16xf32>
    %cst_12 = arith.constant dense<0.000000e+00> : vector<64xf32>
    %18 = vector.multi_reduction <add>, %17, %cst_12 [1] : vector<64x16xf32> to vector<64xf32>
    %19 = vector.shape_cast %18 : vector<64xf32> to vector<64x1xf32>
    %20 = tpu.reciprocal %19 : vector<64x1xf32> -> vector<64x1xf32>
    %21 = vector.broadcast %20 : vector<64x1xf32> to vector<64x16xf32>
    %22 = arith.mulf %17, %21 : vector<64x16xf32>
    %c0_13 = arith.constant 0 : index
    %c0_14 = arith.constant 0 : index
    %23 = vector.load %arg6[%c0_13, %c0_14] : memref<64x16xf32, #tpu.memory_space<vmem>>, vector<64x16xf32>
    tpu.vector_store %arg6[%c0_13, %c0_14], %22 {strides = array<i32>} : memref<64x16xf32, #tpu.memory_space<vmem>>, vector<64x16xf32>,
    return
  }
  func.func @transform_0(%arg0: i32) -> (i32, i32) {
    %c0_i32 = arith.constant 0 : i32
    %c0_i32_0 = arith.constant 0 : i32
    return %arg0, %c0_i32 : i32, i32
  }
  func.func @transform_1(%arg0: i32) -> (i32, i32) {
    %c0_i32 = arith.constant 0 : i32
    %c0_i32_0 = arith.constant 0 : i32
    %c0_i32_1 = arith.constant 0 : i32
    return %c0_i32, %c0_i32_0 : i32, i32
  }
  func.func @transform_2(%arg0: i32) -> (i32, i32) {
    %c0_i32 = arith.constant 0 : i32
    %c0_i32_0 = arith.constant 0 : i32
    %c0_i32_1 = arith.constant 0 : i32
    return %c0_i32, %c0_i32_0 : i32, i32
  }
  func.func @transform_3(%arg0: i32) -> (i32, i32) {
    %c0_i32 = arith.constant 0 : i32
    %c0_i32_0 = arith.constant 0 : i32
    %c0_i32_1 = arith.constant 0 : i32
    return %c0_i32, %c0_i32_0 : i32, i32
  }
  func.func @transform_4(%arg0: i32) -> (i32, i32) {
    %c0_i32 = arith.constant 0 : i32
    %c0_i32_0 = arith.constant 0 : i32
    %c0_i32_1 = arith.constant 0 : i32
    return %c0_i32, %c0_i32_0 : i32, i32
  }
  func.func @transform_5(%arg0: i32) -> (i32, i32) {
    %c0_i32 = arith.constant 0 : i32
    %c0_i32_0 = arith.constant 0 : i32
    return %arg0, %c0_i32 : i32, i32
  }
}

</mosaic_0001>

<bundles_post_ra>
// kernel: tpu_custom_call.1
= control target key start
LH: loop header
LB: loop body
LE: loop exit
PB: predicated region body
PF: predicated region fallthrough
CT: control target
= control target key end

     0   :  { %vm39_vm0 = vcmask 261120   ;;  %vm305_vm1 = vcmask 130048   ;;  %s756_s1 = inlined_call_operand.vmem [shape: f32[32,128], index: 1, kind: input, shape index: {}]   ;;  %s757_s0 = inlined_call_operand.vmem [shape: f32[64,32], index: 0, kind: input, shape index: {}]   ;;  %s758_s3 = inlined_call_operand.vmem [shape: f32[128,16], index: 3, kind: input, shape index: {}]   ;;  %s759_s2 = inlined_call_operand.vmem [shape: f32[1,128], index: 2, kind: input, shape index: {}]   ;;  %s760_s4 = inlined_call_operand.vmem [shape: f32[1,16], index: 4, kind: input, shape index: {}]   ;;  %s761_s5 = inlined_call_operand.vmem [shape: f32[64,16], index: 5, kind: output, shape index: {}]  }
   0x1   :  { %v31_v0 = vld [vmem:[%s756_s1 + $0x18] sm:$0xff]  ;;  %v30_v1 = vld [vmem:[%s756_s1 + $0x10] sm:$0xff]  ;;  %v20_v2 = vld [vmem:[%s757_s0] sm:$0xff] }
   0x2   :  { %452 = vmatprep.subr.mxu0 %v31_v0  ;;  %v29_v3 = vld [vmem:[%s756_s1 + $0x8] sm:$0xff]  ;;  %460 = vmatprep.mubr.msk.f32.mxu0 %vm39_vm0, %v20_v2  ;;  %v28_v4 = vld [vmem:[%s756_s1] sm:$0xff]  ;;  %v192_v5 = vld [vmem:[%s758_s3 + $0x78] sm:$0xff] }
   0x3   :  { %453 = vmatpush3.msra.mxu0 %v31_v0  ;;  %516 = vmatprep.subr.mxu1 %v192_v5  ;;  %v21_v6 = vld [vmem:[%s757_s0 + $0x8] sm:$0xff]  ;;  %v191_v7 = vld [vmem:[%s758_s3 + $0x70] sm:$0xff]  ;;  %v23_v9 = vld [vmem:[%s757_s0 + $0x18] sm:$0xff] }
   0x4   :  { %454 = vmatprep.subr.mxu0 %v30_v1  ;;  %532 = vmatpush3.msra.mxu1 %v192_v5  ;;  %v22_v8 = vld [vmem:[%s757_s0 + $0x10] sm:$0xff]  ;;  %v190_v10 = vld [vmem:[%s758_s3 + $0x68] sm:$0xff]  ;;  %v24_v11 = vld [vmem:[%s757_s0 + $0x20] sm:$0xff] }
   0x5   :  { %455 = vmatpush3.msra.mxu0 %v30_v1  ;;  %517 = vmatprep.subr.mxu1 %v191_v7  ;;  %v189_v12 = vld [vmem:[%s758_s3 + $0x60] sm:$0xff]  ;;  %v25_v13 = vld [vmem:[%s757_s0 + $0x28] sm:$0xff]  ;;  %v188_v14 = vld [vmem:[%s758_s3 + $0x58] sm:$0xff] }
   0x6   :  { %456 = vmatprep.subr.mxu0 %v29_v3  ;;  %533 = vmatpush3.msra.mxu1 %v191_v7  ;;  %v26_v15 = vld [vmem:[%s757_s0 + $0x30] sm:$0xff]  ;;  %v27_v17 = vld [vmem:[%s757_s0 + $0x38] sm:$0xff]  ;;  %v186_v18 = vld [vmem:[%s758_s3 + $0x48] sm:$0xff] }
   0x7   :  { %457 = vmatpush3.msra.mxu0 %v29_v3  ;;  %518 = vmatprep.subr.mxu1 %v190_v10  ;;  %v187_v16 = vld [vmem:[%s758_s3 + $0x50] sm:$0xff]  ;;  %v185_v19 = vld [vmem:[%s758_s3 + $0x40] sm:$0xff]  ;;  %v184_v20 = vld [vmem:[%s758_s3 + $0x38] sm:$0xff] }
   0x8   :  { %458 = vmatprep.subr.mxu0 %v28_v4  ;;  %534 = vmatpush3.msra.mxu1 %v190_v10  ;;  %v183_v21 = vld [vmem:[%s758_s3 + $0x30] sm:$0xff]  ;;  %v182_v22 = vld [vmem:[%s758_s3 + $0x28] sm:$0xff]  ;;  %v181_v23 = vld [vmem:[%s758_s3 + $0x20] sm:$0xff] }
   0x9   :  { %459 = vmatpush3.msra.mxu0 %v28_v4  ;;  %519 = vmatprep.subr.mxu1 %v189_v12  ;;  %v180_v24 = vld [vmem:[%s758_s3 + $0x18] sm:$0xff]  ;;  %v179_v25 = vld [vmem:[%s758_s3 + $0x10] sm:$0xff]  ;;  %v178_v26 = vld [vmem:[%s758_s3 + $0x8] sm:$0xff] }
   0xa   :  { %461 = vmatmul.mubr.msk.f32.vlgmr.msra.gmra.mxu0 %vm39_vm0, %v21_v6  ;;  %472 = vmatprep.subr.mxu0 %v192_v5  ;;  %v177_v27 = vld [vmem:[%s758_s3] sm:$0xff] }
   0xb   :  { %463 = vmatprep.mubr.msk.f32.mxu0 %vm39_vm0, %v22_v8  ;;  %473 = vmatpush3.msra.mxu0 %v192_v5  ;;  %v406_v28 = vld [vmem:[%s759_s2] ss:$0 sm:$0xff] }
   0xc   :  { %474 = vmatprep.subr.mxu0 %v191_v7  ;;  %535 = vmatpush3.msra.mxu1 %v189_v12  ;;  %v415_v53 = vld [vmem:[%s760_s4] ss:$0 sm:$0xff] }
   0xd   :  { %475 = vmatpush3.msra.mxu0 %v191_v7  ;;  %520 = vmatprep.subr.mxu1 %v188_v14 }
   0xe   :  { %464 = vmatmul.mubr.msk.f32.gmra.mxu0 %vm39_vm0, %v23_v9  ;;  %476 = vmatprep.subr.mxu0 %v190_v10 }
   0xf   :  { %466 = vmatprep.mubr.msk.f32.mxu0 %vm39_vm0, %v24_v11  ;;  %477 = vmatpush3.msra.mxu0 %v190_v10 }
  0x10   :  { %478 = vmatprep.subr.mxu0 %v189_v12  ;;  %536 = vmatpush3.msra.mxu1 %v188_v14 }
  0x11   :  { %479 = vmatpush3.msra.mxu0 %v189_v12  ;;  %521 = vmatprep.subr.mxu1 %v187_v16 }
  0x12   :  { %467 = vmatmul.mubr.msk.f32.gmra.mxu0 %vm39_vm0, %v25_v13  ;;  %480 = vmatprep.subr.mxu0 %v188_v14 }
  0x13   :  { %469 = vmatprep.mubr.msk.f32.mxu0 %vm39_vm0, %v26_v15  ;;  %481 = vmatpush3.msra.mxu0 %v188_v14 }
  0x14   :  { %482 = vmatprep.subr.mxu0 %v187_v16  ;;  %537 = vmatpush3.msra.mxu1 %v187_v16 }
  0x15   :  { %483 = vmatpush3.msra.mxu0 %v187_v16  ;;  %522 = vmatprep.subr.mxu1 %v186_v18 }
  0x16   :  { %470 = vmatmul.mubr.msk.f32.gmra.mxu0 %vm39_vm0, %v27_v17  ;;  %484 = vmatprep.subr.mxu0 %v186_v18 }
  0x17   :  { %485 = vmatpush3.msra.mxu0 %v186_v18  ;;  %538 = vmatpush3.msra.mxu1 %v186_v18 }
  0x18   :  { %486 = vmatprep.subr.mxu0 %v185_v19  ;;  %523 = vmatprep.subr.mxu1 %v185_v19 }
  0x19   :  { %487 = vmatpush3.msra.mxu0 %v185_v19  ;;  %539 = vmatpush3.msra.mxu1 %v185_v19 }
  0x1a   :  { %488 = vmatprep.subr.mxu0 %v184_v20  ;;  %524 = vmatprep.subr.mxu1 %v184_v20 }
  0x1b   :  { %489 = vmatpush3.msra.mxu0 %v184_v20  ;;  %540 = vmatpush3.msra.mxu1 %v184_v20 }
  0x1c   :  { %490 = vmatprep.subr.mxu0 %v183_v21  ;;  %525 = vmatprep.subr.mxu1 %v183_v21 }
  0x1d   :  { %491 = vmatpush3.msra.mxu0 %v183_v21  ;;  %541 = vmatpush3.msra.mxu1 %v183_v21 }
  0x1e   :  { %492 = vmatprep.subr.mxu0 %v182_v22  ;;  %526 = vmatprep.subr.mxu1 %v182_v22 }
  0x1f   :  { %493 = vmatpush3.msra.mxu0 %v182_v22  ;;  %542 = vmatpush3.msra.mxu1 %v182_v22 }
  0x20   :  { %494 = vmatprep.subr.mxu0 %v181_v23  ;;  %527 = vmatprep.subr.mxu1 %v181_v23 }
  0x21   :  { %495 = vmatpush3.msra.mxu0 %v181_v23  ;;  %543 = vmatpush3.msra.mxu1 %v181_v23 }
  0x22   :  { %496 = vmatprep.subr.mxu0 %v180_v24  ;;  %528 = vmatprep.subr.mxu1 %v180_v24 }
  0x23   :  { %497 = vmatpush3.msra.mxu0 %v180_v24  ;;  %544 = vmatpush3.msra.mxu1 %v180_v24 }
  0x24   :  { %498 = vmatprep.subr.mxu0 %v179_v25  ;;  %529 = vmatprep.subr.mxu1 %v179_v25 }
  0x25   :  { %499 = vmatpush3.msra.mxu0 %v179_v25  ;;  %545 = vmatpush3.msra.mxu1 %v179_v25 }
  0x26   :  { %500 = vmatprep.subr.mxu0 %v178_v26  ;;  %530 = vmatprep.subr.mxu1 %v178_v26 }
  0x27   :  { %501 = vmatpush3.msra.mxu0 %v178_v26  ;;  %546 = vmatpush3.msra.mxu1 %v178_v26 }
  0x28   :  { %502 = vmatprep.subr.mxu0 %v177_v27  ;;  %531 = vmatprep.subr.mxu1 %v177_v27 }
  0x29   :  { %503 = vmatpush3.msra.mxu0 %v177_v27  ;;  %547 = vmatpush3.msra.mxu1 %v177_v27 }
  0xca   :  { %v462_v29 = vpop.f32.mrf.mxu0 }
  0xcb   :  { %v136_v30 = vadd.f32 %v462_v29, %v406_v28 }
  0xcc   :  { %v130_v31 = vpop.f32.mrf.mxu0 }
  0xcd   :  { %v131_v32 = vadd.f32 %v406_v28, %v130_v31  ;;  %v170_v35 = vmax.f32 %v136_v30, 0.0 }
  0xce   :  { %v465_v33 = vpop.f32.mrf.mxu0 }
  0xcf   :  { %v169_v34 = vmax.f32 %v131_v32, 0.0  ;;  %v146_v36 = vadd.f32 %v465_v33, %v406_v28 }
  0xd0   :  { %v140_v37 = vpop.f32.mrf.mxu0 }
  0xd1   :  { %504 = vmatprep.mubr.f32.mxu0 %v169_v34  ;;  %v141_v38 = vadd.f32 %v406_v28, %v140_v37  ;;  %v172_v42 = vmax.f32 %v146_v36, 0.0 }
  0xd2   :  { %v468_v39 = vpop.f32.mrf.mxu0  ;;  %505 = vmatmul.mubr.f32.vlgmr.msra.gmra.mxu0 %v170_v35 }
  0xd3   :  { %v156_v40 = vadd.f32 %v468_v39, %v406_v28  ;;  %v171_v41 = vmax.f32 %v141_v38, 0.0 }
  0xd4   :  { %v150_v43 = vpop.f32.mrf.mxu0 }
  0xd5   :  { %v151_v44 = vadd.f32 %v406_v28, %v150_v43  ;;  %507 = vmatprep.mubr.f32.mxu1 %v171_v41  ;;  %v174_v45 = vmax.f32 %v156_v40, 0.0 }
  0xd6   :  { %v471_v46 = vpop.f32.mrf.mxu0  ;;  %508 = vmatmul.mubr.f32.vlgmr.msra.gmra.mxu1 %v172_v42 }
  0xd7   :  { %v173_v47 = vmax.f32 %v151_v44, 0.0  ;;  %v166_v48 = vadd.f32 %v471_v46, %v406_v28 }
  0xd8   :  { %v160_v49 = vpop.f32.mrf.mxu0 }
  0xd9   :  { %v161_v50 = vadd.f32 %v406_v28, %v160_v49  ;;  %510 = vmatprep.mubr.f32.mxu1 %v173_v47  ;;  %v176_v51 = vmax.f32 %v166_v48, 0.0 }
  0xda   :  { %511 = vmatmul.mubr.f32.gmra.mxu1 %v174_v45 }
  0xdb   :  { %v175_v52 = vmax.f32 %v161_v50, 0.0 }
  0xdd   :  { %513 = vmatprep.mubr.f32.mxu1 %v175_v52 }
  0xde   :  { %514 = vmatmul.mubr.f32.gmra.mxu1 %v176_v51 }
 0x192   :  { %v506_v54 = vpop.f32.mrf.mxu0 }
 0x193   :  { %v272_v55 = vadd.f32 %v506_v54, %v415_v53 }
 0x194   :  { %v266_v56 = vpop.f32.mrf.mxu0 }
 0x195   :  { %v267_v57 = vadd.f32 %v415_v53, %v266_v56  ;;  %v309_v58 = vsel %vm305_vm1, %v272_v55, -inf }
 0x196   :  { %v509_v59 = vpop.f32.mrf.mxu1  ;;  %310 = vmax.xlane.f32.xlu0 %v309_v58 }
 0x197   :  { %v282_v60 = vadd.f32 %v509_v59, %v415_v53  ;;  %v306_v0 = vsel %vm305_vm1, %v267_v57, -inf }
 0x198   :  { %v276_v61 = vpop.f32.mrf.mxu1 }
 0x199   :  { %v277_v62 = vadd.f32 %v415_v53, %v276_v61  ;;  %v315_v63 = vsel %vm305_vm1, %v282_v60, -inf }
 0x19a   :  { %316 = vmax.xlane.f32.xlu1 %v315_v63  ;;  %v512_v1 = vpop.f32.mrf.mxu1  ;;  %307 = vmax.xlane.f32.xlu0 %v306_v0 }
 0x19b   :  { %v292_v3 = vadd.f32 %v512_v1, %v415_v53  ;;  %v312_v5 = vsel %vm305_vm1, %v277_v62, -inf }
 0x19c   :  { %v286_v2 = vpop.f32.mrf.mxu1 }
 0x19d   :  { %v287_v4 = vadd.f32 %v415_v53, %v286_v2  ;;  %v321_v11 = vsel %vm305_vm1, %v292_v3, -inf }
 0x19e   :  { %v515_v6 = vpop.f32.mrf.mxu1  ;;  %313 = vmax.xlane.f32.xlu1 %v312_v5 }
 0x19f   :  { %v318_v7 = vsel %vm305_vm1, %v287_v4, -inf  ;;  %v302_v9 = vadd.f32 %v515_v6, %v415_v53 }
 0x1a0   :  { %v296_v8 = vpop.f32.mrf.mxu1  ;;  %319 = vmax.xlane.f32.xlu0 %v318_v7 }
 0x1a1   :  { %v297_v10 = vadd.f32 %v415_v53, %v296_v8  ;;  %v327_v13 = vsel %vm305_vm1, %v302_v9, -inf }
 0x1a2   :  { %322 = vmax.xlane.f32.xlu1 %v321_v11 }
 0x1a3   :  { %v324_v12 = vsel %vm305_vm1, %v297_v10, -inf }
 0x1a4   :  { %325 = vmax.xlane.f32.xlu0 %v324_v12 }
 0x1a6   :  { %328 = vmax.xlane.f32.xlu1 %v327_v13 }
 0x21f   :  { %v311_v14 = vpop.xlane.xlu0 %310 }
 0x220   :  { %v331_v15 = vsub.f32 %v272_v55, %v311_v14 }
 0x222   :  { %v340_v16 = vmul.f32 1.442695, %v331_v15 }
 0x223   :  { %v317_v17 = vpop.xlane.xlu1 %316  ;;  %v308_v18 = vpop.xlane.xlu0 %307 }
 0x224   :  { %548 = vpow2.f32 %v340_v16  ;;  %v333_v19 = vsub.f32 %v282_v60, %v317_v17  ;;  %v330_v20 = vsub.f32 %v267_v57, %v308_v18 }
 0x226   :  { %v344_v21 = vmul.f32 1.442695, %v333_v19  ;;  %v338_v22 = vmul.f32 1.442695, %v330_v20 }
 0x227   :  { %v314_v23 = vpop.xlane.xlu1 %313 }
 0x228   :  { %550 = vpow2.f32 %v344_v21  ;;  %v332_v24 = vsub.f32 %v277_v62, %v314_v23 }
 0x229   :  { %552 = vpow2.f32 %v338_v22  ;;  %v320_v25 = vpop.xlane.xlu0 %319 }
 0x22a   :  { %v342_v26 = vmul.f32 1.442695, %v332_v24  ;;  %v334_v27 = vsub.f32 %v287_v4, %v320_v25 }
 0x22b   :  { %v323_v28 = vpop.xlane.xlu1 %322 }
 0x22c   :  { %554 = vpow2.f32 %v342_v26  ;;  %v346_v29 = vmul.f32 1.442695, %v334_v27  ;;  %v335_v30 = vsub.f32 %v292_v3, %v323_v28 }
 0x22d   :  { %v326_v31 = vpop.xlane.xlu0 %325 }
 0x22e   :  { %v348_v32 = vmul.f32 1.442695, %v335_v30  ;;  %v336_v33 = vsub.f32 %v297_v10, %v326_v31  ;;  %556 = vpow2.f32 %v346_v29 }
 0x22f   :  { %v329_v34 = vpop.xlane.xlu1 %328 }
 0x230   :  { %558 = vpow2.f32 %v348_v32  ;;  %v350_v35 = vmul.f32 1.442695, %v336_v33  ;;  %v337_v36 = vsub.f32 %v302_v9, %v329_v34 }
 0x231   :  { %v549_v37 = vpop.eup %548 }
 0x232   :  { %v352_v38 = vmul.f32 1.442695, %v337_v36  ;;  %v357_v39 = vsel %vm305_vm1, %v549_v37, 0.0  ;;  %560 = vpow2.f32 %v350_v35 }
 0x233   :  { %358 = vadd.xlane.f32.xlu1 %v357_v39 }
 0x234   :  { %562 = vpow2.f32 %v352_v38 }
 0x235   :  { %v551_v40 = vpop.eup %550 }
 0x236   :  { %v553_v41 = vpop.eup %552  ;;  %v363_v42 = vsel %vm305_vm1, %v551_v40, 0.0 }
 0x237   :  { %364 = vadd.xlane.f32.xlu1 %v363_v42  ;;  %v354_v43 = vsel %vm305_vm1, %v553_v41, 0.0 }
 0x238   :  { %355 = vadd.xlane.f32.xlu0 %v354_v43 }
 0x239   :  { %v555_v44 = vpop.eup %554 }
 0x23a   :  { %v360_v45 = vsel %vm305_vm1, %v555_v44, 0.0 }
 0x23b   :  { %v557_v46 = vpop.eup %556 }
 0x23c   :  { %361 = vadd.xlane.f32.xlu0 %v360_v45  ;;  %v366_v49 = vsel %vm305_vm1, %v557_v46, 0.0 }
 0x23d   :  { %v559_v47 = vpop.eup %558 }
 0x23e   :  { %v369_v48 = vsel %vm305_vm1, %v559_v47, 0.0 }
 0x23f   :  { %370 = vadd.xlane.f32.xlu1 %v369_v48  ;;  %v561_v50 = vpop.eup %560 }
 0x240   :  { %367 = vadd.xlane.f32.xlu0 %v366_v49  ;;  %v372_v53 = vsel %vm305_vm1, %v561_v50, 0.0 }
 0x241   :  { %v563_v51 = vpop.eup %562 }
 0x242   :  { %v375_v52 = vsel %vm305_vm1, %v563_v51, 0.0 }
 0x243   :  { %376 = vadd.xlane.f32.xlu1 %v375_v52 }
 0x244   :  { %373 = vadd.xlane.f32.xlu0 %v372_v53 }
 0x2bc   :  { %v359_v54 = vpop.xlane.xlu1 %358 }
 0x2bd   :  { %564 = vrcp.f32 %v359_v54 }
 0x2c0   :  { %v365_v55 = vpop.xlane.xlu1 %364 }
 0x2c1   :  { %566 = vrcp.f32 %v365_v55  ;;  %v356_v56 = vpop.xlane.xlu0 %355 }
 0x2c2   :  { %568 = vrcp.f32 %v356_v56 }
 0x2c5   :  { %v362_v57 = vpop.xlane.xlu0 %361 }
 0x2c6   :  { %570 = vrcp.f32 %v362_v57 }
 0x2c8   :  { %v371_v58 = vpop.xlane.xlu1 %370 }
 0x2c9   :  { %572 = vrcp.f32 %v371_v58  ;;  %v368_v59 = vpop.xlane.xlu0 %367 }
 0x2ca   :  { %v565_v60 = vpop.eup %564  ;;  %574 = vrcp.f32 %v368_v59 }
 0x2cb   :  { %v387_v61 = vmul.f32 %v565_v60, %v549_v37 }
 0x2cc   :  { %v377_v62 = vpop.xlane.xlu1 %376 }
 0x2cd   :  { %395 = vst.msk [vmem:[%s761_s5 + $0x8] sm:$0xff] %vm305_vm1, %v387_v61  ;;  %576 = vrcp.f32 %v377_v62  ;;  %v374_v63 = vpop.xlane.xlu0 %373 }
 0x2ce   :  { %v567_v0 = vpop.eup %566  ;;  %578 = vrcp.f32 %v374_v63 }
 0x2cf   :  { %v569_v1 = vpop.eup %568  ;;  %v389_v2 = vmul.f32 %v567_v0, %v551_v40 }
 0x2d0   :  { %v386_v3 = vmul.f32 %v569_v1, %v553_v41 }
 0x2d1   :  { %397 = vst.msk [vmem:[%s761_s5 + $0x18] sm:$0xff] %vm305_vm1, %v389_v2 }
 0x2d2   :  { %394 = vst.msk [vmem:[%s761_s5] sm:$0xff] %vm305_vm1, %v386_v3 }
 0x2d3   :  { %v571_v4 = vpop.eup %570 }
 0x2d4   :  { %v388_v5 = vmul.f32 %v571_v4, %v555_v44 }
 0x2d6   :  { %v573_v6 = vpop.eup %572  ;;  %396 = vst.msk [vmem:[%s761_s5 + $0x10] sm:$0xff] %vm305_vm1, %v388_v5 }
 0x2d7   :  { %v575_v7 = vpop.eup %574  ;;  %v391_v8 = vmul.f32 %v573_v6, %v559_v47 }
 0x2d8   :  { %v390_v9 = vmul.f32 %v575_v7, %v557_v46 }
 0x2d9   :  { %399 = vst.msk [vmem:[%s761_s5 + $0x28] sm:$0xff] %vm305_vm1, %v391_v8 }
 0x2da   :  { %v577_v10 = vpop.eup %576  ;;  %398 = vst.msk [vmem:[%s761_s5 + $0x20] sm:$0xff] %vm305_vm1, %v390_v9 }
 0x2db   :  { %v579_v11 = vpop.eup %578  ;;  %v393_v12 = vmul.f32 %v577_v10, %v563_v51 }
 0x2dc   :  { %v392_v13 = vmul.f32 %v579_v11, %v561_v50 }
 0x2dd   :  { %401 = vst.msk [vmem:[%s761_s5 + $0x38] sm:$0xff] %vm305_vm1, %v393_v12 }
 0x2de   :  { %400 = vst.msk [vmem:[%s761_s5 + $0x30] sm:$0xff] %vm305_vm1, %v392_v13 }

</bundles_post_ra>
